<compile_context>
chip_gen: v7x
topology: tpu7x:2x2x1
jax: 0.10.0
libtpu: 0.0.40
codegen_flags: <defaults>
</compile_context>

<pallas_src>
import jax
import jax.numpy as jnp
from jax.experimental import pallas as pl
from jax.experimental.pallas import tpu as pltpu


# ---------------- model hyperparameters ------------------------------------
B, C, H, W = 2, 4, 16, 16        # NCHW image input
P = 4                            # patch size (conv kernel = stride = P)
N_PATCH = (H // P) * (W // P)    # 16 patches per image
D_PATCH = C * P * P              # 64 features per flattened patch
D_PAD = 128                      # lane-dense contraction dim (col 64 = bias ones)
HIDDEN = 32                      # embedding width
NUM_CLASSES = 8                  # logits width
LANES = 128
SLAB_ROWS = ((D_PAD + HIDDEN + 1 + 7) // 8) * 8   # 168 (sublane aligned)


# ---------------- exact-GELU helpers (safe Mosaic ops only) -----------------
def _erf(z):
    # Abramowitz & Stegun 7.1.26, |error| < 1.5e-7.  Uses only abs/mul/add/
    # exp/select, which all have guaranteed Pallas-TPU lowerings.
    a1, a2, a3, a4, a5 = (0.254829592, -0.284496736, 1.421413741,
                          -1.453152027, 1.061405429)
    p = 0.3275911
    za = jnp.abs(z)
    t = 1.0 / (1.0 + p * za)
    poly = ((((a5 * t + a4) * t + a3) * t + a2) * t + a1) * t
    erf_abs = 1.0 - poly * jnp.exp(-za * za)
    return jnp.where(z < 0, -erf_abs, erf_abs)


def _gelu_exact(x):
    # PyTorch nn.GELU default (erf form): 0.5 * x * (1 + erf(x / sqrt(2)))
    return 0.5 * x * (1.0 + _erf(x * 0.7071067811865475))


# ---------------- Pallas kernel (single gridless invocation) ----------------
def classifier_kernel(patches_ref, weights_ref, out_ref):
    # patches_ref: (B*N_PATCH, D_PAD)   col D_PATCH is ones (fused embed bias)
    # weights_ref: (SLAB_ROWS, 128)     rows [0,128): w_emb_aug in lanes [0,HIDDEN)
    #                                   rows [128,160): w_head in lanes [0,NUM_CLASSES)
    #                                   row  160: b_head
    # out_ref:     (B, NUM_CLASSES)
    b = out_ref.shape[0]
    n_tok = patches_ref.shape[0]
    n_patch = n_tok // b

    # patch embedding + fused bias  (== Conv2d(C, HIDDEN, P, stride=P))
    w_emb = weights_ref[0:D_PAD, 0:HIDDEN]                         # static slice
    h = jnp.dot(patches_ref[...], w_emb,
                preferred_element_type=jnp.float32)                # (n_tok, HIDDEN)
    h = _gelu_exact(h)

    # global mean pool over patches as an MXU matmul; the (b, n_tok) block
    # matrix is generated in-kernel from iota compares (idle-VPU filler).
    col = jax.lax.broadcasted_iota(jnp.int32, (b, n_tok), 1)
    row = jax.lax.broadcasted_iota(jnp.int32, (b, n_tok), 0)
    lo = row * n_patch
    in_img = (col >= lo) & (col < lo + n_patch)
    pool = jnp.where(in_img, jnp.float32(1.0 / n_patch), jnp.float32(0.0))
    pooled = jnp.dot(pool, h, preferred_element_type=jnp.float32)  # (b, HIDDEN)

    # classification head (weights + bias from the same slab -> no extra DMA)
    w_head = weights_ref[D_PAD:D_PAD + HIDDEN, 0:NUM_CLASSES]
    b_head = weights_ref[D_PAD + HIDDEN:D_PAD + HIDDEN + 1, 0:NUM_CLASSES]
    logits = jnp.dot(pooled, w_head,
                     preferred_element_type=jnp.float32) + b_head
    out_ref[...] = logits.astype(out_ref.dtype)                    # (b, NUM_CLASSES)


# ---------------- host-side wrapper -----------------------------------------
def build_weight_slab(w_emb, b_emb, w_head, b_head):
    """Pack all parameters into one lane-dense (SLAB_ROWS, 128) f32 slab (init-time)."""
    slab = jnp.zeros((SLAB_ROWS, LANES), jnp.float32)
    slab = slab.at[0:D_PATCH, 0:HIDDEN].set(w_emb)          # embed weight
    slab = slab.at[D_PATCH:D_PATCH + 1, 0:HIDDEN].set(b_emb)  # embed bias (matches ones col)
    slab = slab.at[D_PAD:D_PAD + HIDDEN, 0:NUM_CLASSES].set(w_head)
    slab = slab.at[D_PAD + HIDDEN, 0:NUM_CLASSES].set(b_head[0])
    return slab


def make_hf_classifier_forward(w_emb, b_emb, w_head, b_head):
    """Returns a jitted forward: x [B, C, H, W] (NCHW f32) -> logits [B, NUM_CLASSES]."""
    slab = build_weight_slab(w_emb, b_emb, w_head, b_head)   # cached constant

    @jax.jit
    def forward(x):
        b, c, h, w = x.shape
        assert (c, h, w) == (C, H, W)
        n_tok = b * N_PATCH

        # Non-overlapping P x P patches, flattened in (C, P, P) order
        # (matches PyTorch Conv2d weight flattening [out, C, P, P]).
        patches = x.reshape(b, c, h // P, P, w // P, P)
        patches = patches.transpose(0, 2, 4, 1, 3, 5)        # [B, H/P, W/P, C, P, P]
        patches = patches.reshape(n_tok, D_PATCH)

        # Lane-dense augmented patches: [features | 1 (bias) | zero pad] -> 128.
        patches_aug = jnp.concatenate(
            [patches,
             jnp.ones((n_tok, 1), jnp.float32),
             jnp.zeros((n_tok, D_PAD - D_PATCH - 1), jnp.float32)], axis=1)

        return pl.pallas_call(
            classifier_kernel,
            out_shape=jax.ShapeDtypeStruct((b, NUM_CLASSES), jnp.float32),
            in_specs=[pl.BlockSpec(memory_space=pltpu.MemorySpace.VMEM),
                      pl.BlockSpec(memory_space=pltpu.MemorySpace.VMEM)],
            out_specs=pl.BlockSpec(memory_space=pltpu.MemorySpace.VMEM),
        )(patches_aug, slab)

    return forward


# ---------------- deterministic parameter init ------------------------------
def init_params(key):
    k1, k2, k3, k4 = jax.random.split(key, 4)
    w_emb = jax.random.normal(k1, (D_PATCH, HIDDEN), jnp.float32) * 0.02
    b_emb = jax.random.normal(k2, (1, HIDDEN), jnp.float32) * 0.02
    w_head = jax.random.normal(k3, (HIDDEN, NUM_CLASSES), jnp.float32) * 0.02
    b_head = jax.random.normal(k4, (1, NUM_CLASSES), jnp.float32) * 0.02
    return w_emb, b_emb, w_head, b_head


if __name__ == "__main__":
    key = jax.random.PRNGKey(0)
    kx, kp = jax.random.split(key)
    x = jax.random.normal(kx, (B, C, H, W), jnp.float32)      # NCHW, like PyTorch
    params = init_params(kp)

    forward = make_hf_classifier_forward(*params)
    logits = forward(x)
    jax.block_until_ready(logits)
    assert logits.shape == (B, NUM_CLASSES)

    # pure-JAX reference (exact erf GELU == PyTorch nn.GELU default)
    w_emb, b_emb, w_head, b_head = params
    patches = x.reshape(B, C, H // P, P, W // P, P).transpose(0, 2, 4, 1, 3, 5)
    patches = patches.reshape(B, N_PATCH, D_PATCH)
    h_ref = jax.nn.gelu(patches @ w_emb + b_emb, approximate=False)
    ref = h_ref.mean(axis=1) @ w_head + b_head
    assert jnp.allclose(logits, ref, atol=1e-4, rtol=1e-4)

    print("KERNEL_OK")
</pallas_src>

<mosaic_0001>
module attributes {stable_mosaic.version = 11 : i64} {
  func.func @classifier_kernel(%arg0: memref<32x128xf32, #tpu.memory_space<vmem>>, %arg1: memref<168x128xf32, #tpu.memory_space<vmem>>, %arg2: memref<2x8xf32, #tpu.memory_space<vmem>>) attributes {dimension_semantics = [], scalar_prefetch = 0 : i64, scratch_operands = 0 : i64, tpu.core_type = #tpu.core_type<tc>} {
    %c0 = arith.constant 0 : index
    %c0_0 = arith.constant 0 : index
    %0 = vector.load %arg1[%c0, %c0_0] : memref<168x128xf32, #tpu.memory_space<vmem>>, vector<128x32xf32>
    %c0_1 = arith.constant 0 : index
    %c0_2 = arith.constant 0 : index
    %1 = vector.load %arg0[%c0_1, %c0_2] : memref<32x128xf32, #tpu.memory_space<vmem>>, vector<32x128xf32>
    %cst = arith.constant dense<0.000000e+00> : vector<32x32xf32>
    %2 = tpu.matmul %1, %0, %cst {dimension_numbers = #tpu.dot_dimension_numbers<[1], [0], [0], [1], [0, 0, 1, 1], [], []>} : vector<32x128xf32>, vector<128x32xf32>, vector<32x32xf32> -> vector<32x32xf32>
    %cst_3 = arith.constant 5.000000e-01 : f32
    %3 = vector.broadcast %cst_3 : f32 to vector<32x32xf32>
    %4 = arith.mulf %3, %2 : vector<32x32xf32>
    %cst_4 = arith.constant 0.707106769 : f32
    %5 = vector.broadcast %cst_4 : f32 to vector<32x32xf32>
    %6 = arith.mulf %2, %5 : vector<32x32xf32>
    %7 = math.absf %6 : vector<32x32xf32>
    %cst_5 = arith.constant 0.327591091 : f32
    %8 = vector.broadcast %cst_5 : f32 to vector<32x32xf32>
    %9 = arith.mulf %8, %7 : vector<32x32xf32>
    %cst_6 = arith.constant 1.000000e+00 : f32
    %10 = vector.broadcast %cst_6 : f32 to vector<32x32xf32>
    %11 = arith.addf %10, %9 : vector<32x32xf32>
    %cst_7 = arith.constant 1.000000e+00 : f32
    %12 = vector.broadcast %cst_7 : f32 to vector<32x32xf32>
    %13 = arith.divf %12, %11 : vector<32x32xf32>
    %cst_8 = arith.constant 1.06140542 : f32
    %14 = vector.broadcast %cst_8 : f32 to vector<32x32xf32>
    %15 = arith.mulf %14, %13 : vector<32x32xf32>
    %cst_9 = arith.constant -1.45315206 : f32
    %16 = vector.broadcast %cst_9 : f32 to vector<32x32xf32>
    %17 = arith.addf %15, %16 : vector<32x32xf32>
    %18 = arith.mulf %17, %13 : vector<32x32xf32>
    %cst_10 = arith.constant 1.42141378 : f32
    %19 = vector.broadcast %cst_10 : f32 to vector<32x32xf32>
    %20 = arith.addf %18, %19 : vector<32x32xf32>
    %21 = arith.mulf %20, %13 : vector<32x32xf32>
    %cst_11 = arith.constant -0.284496725 : f32
    %22 = vector.broadcast %cst_11 : f32 to vector<32x32xf32>
    %23 = arith.addf %21, %22 : vector<32x32xf32>
    %24 = arith.mulf %23, %13 : vector<32x32xf32>
    %cst_12 = arith.constant 0.254829586 : f32
    %25 = vector.broadcast %cst_12 : f32 to vector<32x32xf32>
    %26 = arith.addf %24, %25 : vector<32x32xf32>
    %27 = arith.mulf %26, %13 : vector<32x32xf32>
    %cst_13 = arith.constant 0.000000e+00 : f32
    %28 = vector.broadcast %cst_13 : f32 to vector<32x32xf32>
    %29 = arith.subf %28, %7 : vector<32x32xf32>
    %30 = arith.mulf %29, %7 : vector<32x32xf32>
    %31 = math.exp %30 : vector<32x32xf32>
    %32 = arith.mulf %27, %31 : vector<32x32xf32>
    %cst_14 = arith.constant 1.000000e+00 : f32
    %33 = vector.broadcast %cst_14 : f32 to vector<32x32xf32>
    %34 = arith.subf %33, %32 : vector<32x32xf32>
    %cst_15 = arith.constant 0.000000e+00 : f32
    %35 = vector.broadcast %cst_15 : f32 to vector<32x32xf32>
    %36 = arith.cmpf olt, %6, %35 : vector<32x32xf32>
    %cst_16 = arith.constant 0.000000e+00 : f32
    %37 = vector.broadcast %cst_16 : f32 to vector<32x32xf32>
    %38 = arith.subf %37, %34 : vector<32x32xf32>
    %39 = arith.select %36, %38, %34 : vector<32x32xi1>, vector<32x32xf32>
    %cst_17 = arith.constant 1.000000e+00 : f32
    %40 = vector.broadcast %cst_17 : f32 to vector<32x32xf32>
    %41 = arith.addf %40, %39 : vector<32x32xf32>
    %42 = arith.mulf %4, %41 : vector<32x32xf32>
    %43 = tpu.iota {dimensions = array<i32: 1>} : vector<2x32xi32>
    %44 = tpu.iota {dimensions = array<i32: 0>} : vector<2x32xi32>
    %c16_i32 = arith.constant 16 : i32
    %45 = vector.broadcast %c16_i32 : i32 to vector<2x32xi32>
    %46 = arith.muli %44, %45 : vector<2x32xi32>
    %47 = arith.cmpi sge, %43, %46 : vector<2x32xi32>
    %c16_i32_18 = arith.constant 16 : i32
    %48 = vector.broadcast %c16_i32_18 : i32 to vector<2x32xi32>
    %49 = arith.addi %46, %48 : vector<2x32xi32>
    %50 = arith.cmpi slt, %43, %49 : vector<2x32xi32>
    %51 = arith.andi %47, %50 : vector<2x32xi1>
    %cst_19 = arith.constant 6.250000e-02 : f32
    %cst_20 = arith.constant 0.000000e+00 : f32
    %52 = vector.broadcast %cst_19 : f32 to vector<2x32xf32>
    %53 = vector.broadcast %cst_20 : f32 to vector<2x32xf32>
    %54 = arith.select %51, %52, %53 : vector<2x32xi1>, vector<2x32xf32>
    %cst_21 = arith.constant dense<0.000000e+00> : vector<2x32xf32>
    %55 = tpu.matmul %54, %42, %cst_21 {dimension_numbers = #tpu.dot_dimension_numbers<[1], [0], [0], [1], [0, 0, 1, 1], [], []>} : vector<2x32xf32>, vector<32x32xf32>, vector<2x32xf32> -> vector<2x32xf32>
    %c128 = arith.constant 128 : index
    %c0_22 = arith.constant 0 : index
    %56 = vector.load %arg1[%c128, %c0_22] : memref<168x128xf32, #tpu.memory_space<vmem>>, vector<32x8xf32>
    %c160 = arith.constant 160 : index
    %c0_23 = arith.constant 0 : index
    %57 = vector.load %arg1[%c160, %c0_23] : memref<168x128xf32, #tpu.memory_space<vmem>>, vector<1x8xf32>
    %cst_24 = arith.constant dense<0.000000e+00> : vector<2x8xf32>
    %58 = tpu.matmul %55, %56, %cst_24 {dimension_numbers = #tpu.dot_dimension_numbers<[1], [0], [0], [1], [0, 0, 1, 1], [], []>} : vector<2x32xf32>, vector<32x8xf32>, vector<2x8xf32> -> vector<2x8xf32>
    %59 = vector.broadcast %57 : vector<1x8xf32> to vector<2x8xf32>
    %60 = arith.addf %58, %59 : vector<2x8xf32>
    %c0_25 = arith.constant 0 : index
    %c0_26 = arith.constant 0 : index
    %61 = vector.load %arg2[%c0_25, %c0_26] : memref<2x8xf32, #tpu.memory_space<vmem>>, vector<2x8xf32>
    tpu.vector_store %arg2[%c0_25, %c0_26], %60 {strides = array<i32>} : memref<2x8xf32, #tpu.memory_space<vmem>>, vector<2x8xf32>,
    return
  }
}

</mosaic_0001>

<bundles_post_ra>
// kernel: forward.1
= control target key start
LH: loop header
LB: loop body
LE: loop exit
PB: predicated region body
PF: predicated region fallthrough
CT: control target
= control target key end

     0   :  { %s735_s0 = inlined_call_operand.vmem [shape: f32[32,128], index: 0, kind: input, shape index: {}]   ;;  %s736_s1 = inlined_call_operand.vmem [shape: f32[168,128], index: 1, kind: input, shape index: {}]   ;;  %s737_s2 = inlined_call_operand.hbm [shape: f32[2,8], index: 2, kind: output, shape index: {}]  }
   0x1   :  { %v12_v0 = vld [vmem:[%s736_s1] sm:$0xff]  ;;  %v13_v1 = vld [vmem:[%s736_s1 + $0x8] sm:$0xff]  ;;  %v14_v2 = vld [vmem:[%s736_s1 + $0x10] sm:$0xff] }
   0x2   :  { %v500_v3 = vpack.c.bf16 %v13_v1, %v12_v0  ;;  %v15_v4 = vld [vmem:[%s736_s1 + $0x18] sm:$0xff]  ;;  %v16_v6 = vld [vmem:[%s736_s1 + $0x20] sm:$0xff]  ;;  %v17_v7 = vld [vmem:[%s736_s1 + $0x28] sm:$0xff] }
   0x3   :  { %v504_v5 = vpack.c.bf16 %v15_v4, %v14_v2  ;;  %v508_v8 = vpack.c.bf16 %v17_v7, %v16_v6  ;;  %v28_v9 = vld [vmem:[%s735_s0] sm:$0xff]  ;;  %v18_v10 = vld [vmem:[%s736_s1 + $0x30] sm:$0xff]  ;;  %v19_v11 = vld [vmem:[%s736_s1 + $0x38] sm:$0xff] }
   0x4   :  { %501 = vmatprep.subr.bf16.mxu0 %v500_v3  ;;  %472 = vmatprep.mubr.f32.mxu0 %v28_v9 }
   0x5   :  { %503 = vmatpush3.bf16.msra.mxu0 %v500_v3 }
   0x6   :  { %505 = vmatprep.subr.bf16.mxu0 %v504_v5 }
   0x7   :  { %7 = vsyncpa [#allocation3], 0  ;;  %v512_v12 = vpack.c.bf16 %v19_v11, %v18_v10  ;;  %v20_v13 = vld [vmem:[%s736_s1 + $0x40] sm:$0xff]  ;;  %v21_v14 = vld [vmem:[%s736_s1 + $0x48] sm:$0xff]  ;;  %v588_v28 = vmov 0.0|0.0   ;;  %vm589_vm0 = vmmov 0  }
   0x8   :  { %v516_v15 = vpack.c.bf16 %v21_v14, %v20_v13  ;;  %v22_v16 = vld [vmem:[%s736_s1 + $0x50] sm:$0xff]  ;;  %v23_v17 = vld [vmem:[%s736_s1 + $0x58] sm:$0xff]  ;;  %v24_v19 = vld [vmem:[%s736_s1 + $0x60] sm:$0xff]  ;;  %532 = vmatprep.subr.bf16.mxu1 %v588_v28  ;;  %v590_v29 = vmov 0.0   ;;  %vm235_vm8 = vcmask 261120   ;;  %s591_s30 = smov [#allocation2]  }
   0x9   :  { %507 = vmatpush3.bf16.msra.mxu0 %v504_v5  ;;  %v520_v18 = vpack.c.bf16 %v23_v17, %v22_v16  ;;  %v25_v20 = vld [vmem:[%s736_s1 + $0x68] sm:$0xff]  ;;  %v26_v22 = vld [vmem:[%s736_s1 + $0x70] sm:$0xff]  ;;  %v27_v23 = vld [vmem:[%s736_s1 + $0x78] sm:$0xff]  ;;  %486 = vmatprep.mubr.msk.f32.mxu1 %vm589_vm0, %v590_v29  ;;  %s399_s3 = sshll.u32 %s591_s30, 4  ;;  %vm391_vm9 = vcmask 58368   ;;  %s400_s3 = int_to_ptr.vmem [resolvable:$true] %s399_s3 }
   0xa   :  { %509 = vmatprep.subr.bf16.mxu0 %v508_v8  ;;  %v524_v21 = vpack.c.bf16 %v25_v20, %v24_v19  ;;  %v528_v24 = vpack.c.bf16 %v27_v23, %v26_v22  ;;  %v29_v25 = vld [vmem:[%s735_s0 + $0x8] sm:$0xff]  ;;  %v30_v26 = vld [vmem:[%s735_s0 + $0x10] sm:$0xff]  ;;  %v31_v27 = vld [vmem:[%s735_s0 + $0x18] sm:$0xff]  ;;  %s564_s4 = scalar_lea.vmem %s400_s3, 32  ;;  %p569_p1 = scmp.lt.s32.totalorder %s400_s3, %s400_s3 }
   0xb   :  { %p565_p0 = scmp.ne.s32.totalorder %s400_s3, %s564_s4  ;;  %p570_p2 = scmp.lt.s32.totalorder %s564_s4, %s564_s4 }
   0xd   :  { %511 = vmatpush3.bf16.msra.mxu0 %v508_v8  ;;  %p571_p3 = por %p570_p2, %p569_p1 }
   0xe   :  { %513 = vmatprep.subr.bf16.mxu0 %v512_v12 }
   0xf   :  { %p572_p4 = pnand %p571_p3, %p565_p0 }
  0x11   :  { %515 = vmatpush3.bf16.msra.mxu0 %v512_v12 }
  0x12   :  { %517 = vmatprep.subr.bf16.mxu0 %v516_v15 }
  0x15   :  { %519 = vmatpush3.bf16.msra.mxu0 %v516_v15 }
  0x16   :  { %521 = vmatprep.subr.bf16.mxu0 %v520_v18 }
  0x19   :  { %523 = vmatpush3.bf16.msra.mxu0 %v520_v18 }
  0x1a   :  { %525 = vmatprep.subr.bf16.mxu0 %v524_v21 }
  0x1d   :  { %527 = vmatpush3.bf16.msra.mxu0 %v524_v21 }
  0x1e   :  { %529 = vmatprep.subr.bf16.mxu0 %v528_v24 }
  0x21   :  { %531 = vmatpush3.bf16.msra.mxu0 %v528_v24 }
  0x24   :  { %473 = vmatmul.mubr.f32.vlgmr.msra.gmra.mrb[0].mxu0 %v29_v25 }
  0x25   :  { %475 = vmatprep.mubr.f32.mxu0 %v30_v26 }
  0x28   :  { %476 = vmatmul.mubr.f32.gmra.mrb[2].mxu0 %v31_v27 }
  0xf7   :  { %v670_v30 = vpop.f32.mrb[0].mxu0 }
  0xf8   :  { %v673_v31 = vmul.f32 0.70710677, %v670_v30  ;;  %v675_v32 = vpop.f32.mrb[1].mxu0 }
  0xf9   :  { %v678_v33 = vmul.f32 0.70710677, %v675_v32 }
  0xfa   :  { %v126_v34 = vand.u32 2147483647, %v673_v31  ;;  %vm206_vm1 = vcmp.lt.f32.partialorder %v673_v31, 0.0 }
  0xfb   :  { %v125_v35 = vand.u32 2147483647, %v678_v33  ;;  %v682_v36 = vpop.f32.mrb[2].mxu0  ;;  %vm205_vm2 = vcmp.lt.f32.partialorder %v678_v33, 0.0 }
  0xfc   :  { %v130_v37 = vmul.f32 0.3275911, %v126_v34  ;;  %v685_v38 = vmul.f32 0.70710677, %v682_v36  ;;  %v687_v40 = vpop.f32.mrb[3].mxu0  ;;  %v182_v50 = vsub.f32 0.0, %v126_v34 }
  0xfd   :  { %v129_v39 = vmul.f32 0.3275911, %v125_v35  ;;  %v691_v44 = vmul.f32 0.70710677, %v687_v40  ;;  %v181_v51 = vsub.f32 0.0, %v125_v35 }
  0xfe   :  { %v134_v41 = vadd.f32 1.0, %v130_v37  ;;  %v128_v42 = vand.u32 2147483647, %v685_v38  ;;  %v186_v53 = vmul.f32 %v182_v50, %v126_v34  ;;  %vm208_vm3 = vcmp.lt.f32.partialorder %v685_v38, 0.0 }
  0xff   :  { %v133_v43 = vadd.f32 1.0, %v129_v39  ;;  %v127_v46 = vand.u32 2147483647, %v691_v44  ;;  %v185_v56 = vmul.f32 %v181_v51, %v125_v35  ;;  %v225_v39 = vlaneseq }
 0x100   :  { %548 = vrcp.f32 %v134_v41  ;;  %v132_v45 = vmul.f32 0.3275911, %v128_v42  ;;  %v184_v54 = vsub.f32 0.0, %v128_v42  ;;  %v191_v62 = vmul.f32 1.442695, %v186_v53 }
 0x101   :  { %550 = vrcp.f32 %v133_v43  ;;  %v131_v48 = vmul.f32 0.3275911, %v127_v46  ;;  %v183_v59 = vsub.f32 0.0, %v127_v46  ;;  %v189_v1 = vmul.f32 1.442695, %v185_v56 }
 0x102   :  { %v136_v47 = vadd.f32 1.0, %v132_v45  ;;  %v188_v63 = vmul.f32 %v184_v54, %v128_v42  ;;  %v228_v53 = vshrl.u32 %v225_v39, 7  ;;  %vm207_vm4 = vcmp.lt.f32.partialorder %v691_v44, 0.0 }
 0x103   :  { %v135_v49 = vadd.f32 1.0, %v131_v48  ;;  %v187_v7 = vmul.f32 %v183_v59, %v127_v46 }
 0x104   :  { %552 = vrcp.f32 %v136_v47  ;;  %v195_v9 = vmul.f32 1.442695, %v188_v63 }
 0x105   :  { %554 = vrcp.f32 %v135_v49  ;;  %v193_v17 = vmul.f32 1.442695, %v187_v7 }
 0x106   :  { %556 = vpow2.f32 %v191_v62 }
 0x107   :  { %558 = vpow2.f32 %v189_v1  ;;  %v118_v1 = vmul.f32 0.5, %v670_v30 }
 0x108   :  { %560 = vpow2.f32 %v195_v9 }
 0x109   :  { %562 = vpow2.f32 %v193_v17  ;;  %v309_v17 = vld [vmem:[%s736_s1 + $0x80] sm:$0xff] }
 0x10a   :  { %v549_v52 = vpop.eup %548 }
 0x10b   :  { %v551_v55 = vpop.eup %550  ;;  %v146_v57 = vmul.f32 1.0614054, %v549_v52 }
 0x10c   :  { %v145_v58 = vmul.f32 1.0614054, %v551_v55 }
 0x10d   :  { %v150_v60 = vadd.f32 -1.4531521, %v146_v57 }
 0x10e   :  { %v553_v61 = vpop.eup %552  ;;  %v149_v0 = vadd.f32 -1.4531521, %v145_v58 }
 0x10f   :  { %v148_v2 = vmul.f32 1.0614054, %v553_v61  ;;  %v154_v3 = vmul.f32 %v549_v52, %v150_v60  ;;  %v555_v5 = vpop.eup %554 }
 0x110   :  { %v153_v4 = vmul.f32 %v551_v55, %v149_v0  ;;  %v147_v10 = vmul.f32 1.0614054, %v555_v5  ;;  %v557_v41 = vpop.eup %556  ;;  %v229_v0 = vmul.u32 16, %v228_v53 }
 0x111   :  { %v152_v6 = vadd.f32 -1.4531521, %v148_v2  ;;  %v158_v8 = vadd.f32 1.4214138, %v154_v3  ;;  %v559_v45 = vpop.eup %558 }
 0x112   :  { %v157_v11 = vadd.f32 1.4214138, %v153_v4  ;;  %v151_v14 = vadd.f32 -1.4531521, %v147_v10  ;;  %v561_v54 = vpop.eup %560  ;;  %v117_v4 = vmul.f32 0.5, %v675_v32  ;;  %v231_v33 = vadd.s32 16, %v229_v0 }
 0x113   :  { %v156_v12 = vmul.f32 %v553_v61, %v152_v6  ;;  %v162_v13 = vmul.f32 %v549_v52, %v158_v8  ;;  %v563_v62 = vpop.eup %562  ;;  %v226_v8 = vand.u32 127, %v225_v39 }
 0x114   :  { %v161_v15 = vmul.f32 %v551_v55, %v157_v11  ;;  %v155_v19 = vmul.f32 %v555_v5, %v151_v14 }
 0x115   :  { %v160_v16 = vadd.f32 1.4214138, %v156_v12  ;;  %v166_v18 = vadd.f32 -0.28449672, %v162_v13  ;;  %v120_v13 = vmul.f32 0.5, %v682_v36  ;;  %vm230_vm5 = vcmp.ge.s32.totalorder %v226_v8, %v229_v0  ;;  %v310_v36 = vld [vmem:[%s736_s1 + $0x88] sm:$0xff] }
 0x116   :  { %v165_v20 = vadd.f32 -0.28449672, %v161_v15  ;;  %v159_v23 = vadd.f32 1.4214138, %v155_v19  ;;  %v119_v15 = vmul.f32 0.5, %v687_v40  ;;  %vm232_vm6 = vcmp.lt.s32.totalorder %v226_v8, %v231_v33  ;;  %v311_v19 = vld [vmem:[%s736_s1 + $0x90] sm:$0xff] }
 0x117   :  { %v164_v21 = vmul.f32 %v553_v61, %v160_v16  ;;  %v170_v22 = vmul.f32 %v549_v52, %v166_v18  ;;  %vm233_vm7 = vmand %vm230_vm5, %vm232_vm6  ;;  %v539_v40 = vpack.c.bf16 %v310_v36, %v309_v17 }
 0x118   :  { %v169_v24 = vmul.f32 %v551_v55, %v165_v20  ;;  %v163_v27 = vmul.f32 %v555_v5, %v159_v23  ;;  %v234_v18 = vsel %vm233_vm7, 0.0625, %v590_v29  ;;  %v312_v20 = vld [vmem:[%s736_s1 + $0x98] sm:$0xff] }
 0x119   :  { %v168_v25 = vadd.f32 -0.28449672, %v164_v21  ;;  %v174_v26 = vadd.f32 0.2548296, %v170_v22  ;;  %v542_v21 = vpack.c.bf16 %v312_v20, %v311_v19 }
 0x11a   :  { %v173_v34 = vadd.f32 0.2548296, %v169_v24  ;;  %v167_v42 = vadd.f32 -0.28449672, %v163_v27  ;;  %v408_v24 = vld [vmem:[%s736_s1 + $0xa0] ss:$0 sm:$0xff] }
 0x11b   :  { %v172_v35 = vmul.f32 %v553_v61, %v168_v25  ;;  %v178_v37 = vmul.f32 %v549_v52, %v174_v26 }
 0x11c   :  { %v177_v43 = vmul.f32 %v551_v55, %v173_v34  ;;  %v171_v48 = vmul.f32 %v555_v5, %v167_v42 }
 0x11d   :  { %v176_v46 = vadd.f32 0.2548296, %v172_v35  ;;  %v198_v47 = vmul.f32 %v557_v41, %v178_v37 }
 0x11e   :  { %v197_v49 = vmul.f32 %v559_v45, %v177_v43  ;;  %v175_v56 = vadd.f32 0.2548296, %v171_v48 }
 0x11f   :  { %v180_v50 = vmul.f32 %v553_v61, %v176_v46  ;;  %v202_v51 = vsub.f32 1.0, %v198_v47 }
 0x120   :  { %v201_v57 = vsub.f32 1.0, %v197_v49  ;;  %v179_v52 = vmul.f32 %v555_v5, %v175_v56 }
 0x121   :  { %v200_v58 = vmul.f32 %v561_v54, %v180_v50  ;;  %v210_v59 = vsub.f32 0.0, %v202_v51 }
 0x122   :  { %v209_v60 = vsub.f32 0.0, %v201_v57  ;;  %v199_v61 = vmul.f32 %v563_v62, %v179_v52 }
 0x123   :  { %v204_v55 = vsub.f32 1.0, %v200_v58  ;;  %v214_v63 = vsel %vm206_vm1, %v210_v59, %v202_v51 }
 0x124   :  { %v213_v2 = vsel %vm205_vm2, %v209_v60, %v201_v57  ;;  %v218_v3 = vadd.f32 1.0, %v214_v63  ;;  %v203_v31 = vsub.f32 1.0, %v199_v61 }
 0x125   :  { %v212_v6 = vsub.f32 0.0, %v204_v55  ;;  %v217_v7 = vadd.f32 1.0, %v213_v2 }
 0x126   :  { %v222_v5 = vmul.f32 %v218_v3, %v118_v1  ;;  %v211_v12 = vsub.f32 0.0, %v203_v31 }
 0x127   :  { %v216_v9 = vsel %vm208_vm3, %v212_v6, %v204_v55  ;;  %v221_v10 = vmul.f32 %v217_v7, %v117_v4 }
 0x128   :  { %v220_v11 = vadd.f32 1.0, %v216_v9  ;;  %v215_v14 = vsel %vm207_vm4, %v211_v12, %v203_v31 }
 0x129   :  { %v533_v30 = vpack.c.bf16 %v222_v5, %v221_v10  ;;  %v219_v16 = vadd.f32 1.0, %v215_v14 }
 0x12a   :  { %v224_v32 = vmul.f32 %v220_v11, %v120_v13 }
 0x12b   :  { %534 = vmatpush3.bf16.msra.mxu1 %v533_v30  ;;  %v223_v38 = vmul.f32 %v219_v16, %v119_v15 }
 0x12c   :  { %535 = vmatprep.subr.bf16.mxu1 %v588_v28 }
 0x12d   :  { %v536_v44 = vpack.c.bf16 %v224_v32, %v223_v38 }
 0x12f   :  { %537 = vmatpush3.bf16.msra.mxu1 %v536_v44 }
 0x130   :  { %538 = vmatprep.subr.bf16.mxu1 %v588_v28 }
 0x132   :  { %487 = vmatmul.mubr.msk.f32.vlgmr.msra.gmra.mrb[0].mxu1 %vm235_vm8, %v234_v18 }
 0x133   :  { %540 = vmatpush3.bf16.msra.mxu1 %v539_v40  ;;  %497 = vmatprep.mubr.msk.f32.mxu1 %vm589_vm0, %v590_v29 }
 0x134   :  { %541 = vmatprep.subr.bf16.mxu1 %v588_v28 }
 0x137   :  { %543 = vmatpush3.bf16.msra.mxu1 %v542_v21 }
 0x205   :  { %v305_v22 = vpop.f32.mrb[0].mxu1 }
 0x206   :  { %v488_v23 = vpop.f32.mrb[1].mxu1  ;;  %498 = vmatmul.mubr.msk.f32.vlgmr.msra.gmra.mrb[2].mxu1 %vm235_vm8, %v305_v22 }
 0x2d9   :  { %v387_v25 = vpop.f32.mrb[2].mxu1 }
 0x2da   :  { %v388_v26 = vadd.f32 %v408_v24, %v387_v25  ;;  %v499_v27 = vpop.f32.mrb[3].mxu1 }
 0x2dc   :  { %392 = vst.msk [vmem:[#allocation2] sm:$0x3] %vm391_vm9, %v388_v26 }
 0x2dd   :  { %575 = shalt.err (!%p572_p4)
}
 0x2de   :  { %s576_s7 = scalar_lea.hbm %s737_s2, 32 }
 0x2df   :  { %p577_p5 = scmp.ne.s32.totalorder %s737_s2, %s576_s7  ;;  %p580_p6 = scmp.lt.u32.totalorder %s576_s7, %s737_s2 }
 0x2e1   :  { %p582_p7 = pnand %p580_p6, %p577_p5 }
 0x2e3   :  { %585 = shalt.err (!%p582_p7)
}
 0x2e4   :  { %402 = dma.vmem_to_hbm [thread:$0]  %s400_s3, 32, %s737_s2, [#allocation3]  }
 0x2e5   :  { %586 = dma.done.wait [#allocation3], 32  }
 0x2e6   :  { %587 = vsyncadd [#allocation3], 4294967264 }
 0x2e7   :  { %406 = vsyncpa [#allocation3], 1 }

</bundles_post_ra>
